<compile_context>
chip_gen: v5e
topology: v5e:2x2
jax: 0.10.0
libtpu: 0.0.40
codegen_flags: <defaults>
</compile_context>

<pallas_src>
import math

import jax
import jax.numpy as jnp
from jax.experimental import pallas as pl
from jax.experimental.pallas import tpu as pltpu


# ---------------------------------------------------------------------------
# Fused kernels (prep + streaming blend in one pallas_call)
# ---------------------------------------------------------------------------

def _fused_lane_dense_kernel(dc_ref, wa_ref, wu_ref, enc_ref, out_ref,
                             alpha_sc, pat_sc):
    """Lane-dense fused ScratchPad kernel.

    Grid: (B, num_row_tiles); dimension_semantics = ("parallel", "arbitrary").

    dc_ref   : [1, 1, K+1]    f32, per-batch concat([dec, ctx, 1.0])
    wa_ref   : [1, K+1]       f32, mlp_alpha row (ctx slices summed, bias folded)
    wu_ref   : [L, K+1, 128]  f32, mlp_u^T (+bias row), output features
                              replicated to lcm(E,128) lanes, split into L rows
    enc_ref  : [1, TR, 128]   encoder tile (flattened (S,E) -> 128-lane rows)
    out_ref  : [1, TR, 128]
    alpha_sc : [1, 1] f32     VMEM scratch, persists across the row-tile loop
    pat_sc   : [TR, 128]      VMEM scratch: (1-alpha)*u replicated over the tile
    """
    r = pl.program_id(1)
    L = wu_ref.shape[0]
    TR = pat_sc.shape[0]

    @pl.when(r == 0)
    def _prep():
        dcb = dc_ref[0]                                             # [1, K+1]
        logit = jnp.sum(dcb * wa_ref[...], axis=-1, keepdims=True)  # [1, 1]
        alpha = jax.nn.sigmoid(logit)
        alpha_sc[...] = alpha
        one_minus_a = 1.0 - alpha
        # (1 - alpha) * tanh(mlp_u([dec, ctx])): already lane-replicated via the
        # pre-replicated weight columns, so no in-kernel gather is needed.
        for j in range(L):                                          # static, small
            uj = jnp.tanh(jnp.dot(dcb, wu_ref[j],
                                  preferred_element_type=jnp.float32))
            pat_sc[pl.ds(j, 1), :] = (one_minus_a * uj).astype(pat_sc.dtype)
        # Replicate the L-row pattern over the full tile height once per batch
        # (log2 doubling), so the steady-state blend is a pure VMEM stream.
        filled = L
        while filled < TR:
            n = min(filled, TR - filled)
            pat_sc[pl.ds(filled, n), :] = pat_sc[pl.ds(0, n), :]
            filled += n

    a = alpha_sc[...].astype(out_ref.dtype)                         # [1, 1]
    out_ref[...] = a[None] * enc_ref[...] + pat_sc[...][None]


def _fused_rowwise_kernel(dc_ref, wa_ref, wu_ref, enc_ref, out_ref,
                          alpha_sc, ub_sc):
    """Fallback fused kernel tiled over the sequence axis (E stays the lane dim).

    dc_ref  : [1, 1, K+1] f32
    wa_ref  : [1, K+1]    f32
    wu_ref  : [K+1, E]    f32 (mlp_u^T with bias row)
    enc_ref : [1, TS, E]
    out_ref : [1, TS, E]
    alpha_sc: [1, 1] f32  VMEM scratch
    ub_sc   : [1, E]      VMEM scratch, (1-alpha)*u
    """
    r = pl.program_id(1)

    @pl.when(r == 0)
    def _prep():
        dcb = dc_ref[0]                                             # [1, K+1]
        logit = jnp.sum(dcb * wa_ref[...], axis=-1, keepdims=True)
        alpha = jax.nn.sigmoid(logit)
        alpha_sc[...] = alpha
        u = jnp.tanh(jnp.dot(dcb, wu_ref[...],
                             preferred_element_type=jnp.float32))   # [1, E]
        ub_sc[...] = ((1.0 - alpha) * u).astype(ub_sc.dtype)

    a = alpha_sc[...].astype(out_ref.dtype)
    out_ref[...] = a[None] * enc_ref[...] + ub_sc[...][None]


# ---------------------------------------------------------------------------
# Tiling helpers
# ---------------------------------------------------------------------------

_SUBLANE = {4: 8, 2: 16, 1: 32}    # dtype itemsize -> minimum sublane multiple


def _tile_budget_bytes():
    """Per-block HBM-stream budget, tuned per TPU generation."""
    try:
        kind = jax.devices()[0].device_kind.lower()
    except Exception:
        kind = ""
    if any(v in kind for v in ("v2", "v3", "v4", "v5")):
        return 1 << 20       # ~0.8-1.2 TB/s HBM: 1 MiB already ~85-90% roofline
    if "v6" in kind:
        return 2 << 20       # ~1.4 TB/s: 2 MiB -> ~90% roofline
    return 4 << 20           # v7x-class (~3.2 TB/s/TC): 4 MiB amortizes step cost


def _pick_rows(total_rows, row_bytes, align, batch, budget):
    """Tile rows: <= budget, sublane-aligned, cdiv-friendly (no exact divisors)."""
    max_rows = max(1, budget // max(1, row_bytes))
    if max_rows >= total_rows:
        return total_rows                       # one full-extent block (rule waived)
    rows = max(align, (max_rows // align) * align)
    rows = min(rows, total_rows)
    # v7x has 2 TensorCores: keep a handful of grid steps so the parallel axis
    # isn't collapsed into 1-2 giant blocks (idling a core).
    while rows > align and batch * ((total_rows + rows - 1) // rows) < 8:
        cand = ((rows // 2) // align) * align
        if cand < align:
            break
        rows = cand
    return rows


# ---------------------------------------------------------------------------
# Wrapper
# ---------------------------------------------------------------------------

def scratchpad_forward(encoder_output, decoder_state_h, context, params):
    """Pallas ScratchPad forward.

    encoder_output  : [B, S, E]
    decoder_state_h : [num_layers, B, D]   (decoder_state[0] in the PyTorch code)
    context         : [B, E]
    params          : (W_u [E, D+E], b_u [E], W_a [1, D+2E], b_a [1])

    Returns out[b, s, :] = alpha[b] * enc[b, s, :] + (1 - alpha[b]) * u[b, :]
    """
    W_u, b_u, W_a, b_a = params
    B, S, E = encoder_output.shape
    dec = decoder_state_h[-1]                       # top layer  [B, D]
    D = dec.shape[-1]
    K = D + E
    dtype = encoder_output.dtype
    itemsize = jnp.dtype(dtype).itemsize
    sub = _SUBLANE.get(itemsize, 8)
    budget = _tile_budget_bytes()
    f32 = jnp.float32

    # ---- one-time layout plumbing (tiny, done in XLA) -----------------------
    # [dec, ctx, 1] so both mlp biases fold into the dot / row product.
    dc = jnp.concatenate(
        [dec.astype(f32), context.astype(f32), jnp.ones((B, 1), f32)],
        axis=-1).reshape(B, 1, K + 1)
    # mlp_alpha sees [dec, ctx, ctx] -> sum the two ctx weight slices.
    wa = jnp.concatenate(
        [W_a[:, :D], W_a[:, D:D + E] + W_a[:, D + E:], b_a.reshape(1, 1)],
        axis=-1).astype(f32)                                        # [1, K+1]
    wu = jnp.concatenate(
        [jnp.transpose(W_u), b_u[None, :]], axis=0).astype(f32)     # [K+1, E]

    vmem = pl.BlockSpec(memory_space=pltpu.MemorySpace.VMEM)
    lane = 128
    g = math.gcd(E, lane)
    L = E // g                      # pattern period (rows) in the flattened view
    rep_cols = L * lane             # lcm(E, 128)
    rep_bytes = rep_cols * (K + 1) * 4

    # TODO(synk): callers that can donate encoder_output could add
    # input_output_aliases to halve the HBM footprint; not done here because the
    # test reuses the input afterwards.

    if (S * E) % lane == 0 and rep_bytes <= (4 << 20) and L <= 64:
        # ---- lane-dense path: flatten (S, E) into rows of exactly 128 lanes ----
        R = (S * E) // lane
        enc3 = encoder_output.reshape(B, R, lane)
        # Replicate mlp_u's output columns to lcm(E,128) so the kernel emits the
        # lane-replicated pattern directly (no in-kernel gather / reshape).
        idx = jnp.arange(rep_cols) % E
        wu_rep = jnp.transpose(wu[:, idx].reshape(K + 1, L, lane), (1, 0, 2))
        step = (L * sub) // math.gcd(L, sub)        # lcm(L, sublane alignment)
        tr = _pick_rows(R, lane * itemsize, step, B, budget)
        num_r = pl.cdiv(R, tr)
        tile_bytes = tr * lane * itemsize
        vmem_limit = int(min(48 << 20, 5 * tile_bytes + rep_bytes + (8 << 20)))

        out3 = pl.pallas_call(
            _fused_lane_dense_kernel,
            out_shape=jax.ShapeDtypeStruct((B, R, lane), dtype),
            grid=(B, num_r),
            in_specs=[
                pl.BlockSpec((1, 1, K + 1), lambda b, r: (b, 0, 0)),   # dc
                vmem,                                                  # wa
                vmem,                                                  # wu_rep
                pl.BlockSpec((1, tr, lane), lambda b, r: (b, r, 0)),   # enc tile
            ],
            out_specs=pl.BlockSpec((1, tr, lane), lambda b, r: (b, r, 0)),
            scratch_shapes=[pltpu.VMEM((1, 1), jnp.float32),
                            pltpu.VMEM((tr, lane), dtype)],
            compiler_params=pltpu.CompilerParams(
                dimension_semantics=("parallel", "arbitrary"),
                vmem_limit_bytes=vmem_limit),
        )(dc, wa, wu_rep, enc3)
        return out3.reshape(B, S, E)

    # ---- fallback: tile the sequence axis, E stays the lane dimension ---------
    # TODO(synk): E with (S*E) % 128 != 0 emits masked partial stores here; pad E
    # in the caller (or extend the lane-dense path) if this becomes a hot shape.
    ts = _pick_rows(S, E * itemsize, sub, B, budget)
    num_s = pl.cdiv(S, ts)
    tile_bytes = ts * E * itemsize
    wu_bytes = (K + 1) * E * 4
    vmem_limit = int(min(48 << 20, 5 * tile_bytes + wu_bytes + (8 << 20)))

    return pl.pallas_call(
        _fused_rowwise_kernel,
        out_shape=jax.ShapeDtypeStruct((B, S, E), dtype),
        grid=(B, num_s),
        in_specs=[
            pl.BlockSpec((1, 1, K + 1), lambda b, s: (b, 0, 0)),       # dc
            vmem,                                                      # wa
            vmem,                                                      # wu
            pl.BlockSpec((1, ts, E), lambda b, s: (b, s, 0)),          # enc tile
        ],
        out_specs=pl.BlockSpec((1, ts, E), lambda b, s: (b, s, 0)),
        scratch_shapes=[pltpu.VMEM((1, 1), jnp.float32),
                        pltpu.VMEM((1, E), dtype)],
        compiler_params=pltpu.CompilerParams(
            dimension_semantics=("parallel", "arbitrary"),
            vmem_limit_bytes=vmem_limit),
    )(dc, wa, wu, encoder_output)


# ---------------------------------------------------------------------------
# Pure-JAX reference (mirrors the PyTorch forward)
# ---------------------------------------------------------------------------

def _reference(encoder_output, decoder_state_h, context, params):
    W_u, b_u, W_a, b_a = params
    dec = decoder_state_h[-1]
    inp_u = jnp.concatenate([dec, context], axis=-1)
    u = jnp.tanh(inp_u @ W_u.T + b_u)
    inp_a = jnp.concatenate([dec, context, context], axis=-1)
    alpha = jax.nn.sigmoid(inp_a @ W_a.T + b_a)          # [B, 1]
    a = alpha[:, None, :]
    return a * encoder_output + (1.0 - a) * u[:, None, :]


def _make_case(key, B, S, E, D, num_layers=2):
    k = jax.random.split(key, 7)
    enc = jax.random.normal(k[0], (B, S, E), jnp.float32)
    dec_h = jax.random.normal(k[1], (num_layers, B, D), jnp.float32)
    ctx = jax.random.normal(k[2], (B, E), jnp.float32)
    W_u = jax.random.normal(k[3], (E, D + E), jnp.float32) * 0.1
    b_u = jax.random.normal(k[4], (E,), jnp.float32) * 0.1
    W_a = jax.random.normal(k[5], (1, D + 2 * E), jnp.float32) * 0.1
    b_a = jax.random.normal(k[6], (1,), jnp.float32) * 0.1
    return enc, dec_h, ctx, (W_u, b_u, W_a, b_a)


if __name__ == "__main__":
    key = jax.random.PRNGKey(0)
    cases = [
        dict(B=2, S=8, E=16, D=32),    # lane-dense, L=1, single row tile
        dict(B=2, S=32, E=24, D=16),   # lane-dense, L=3 pattern + in-kernel fill
        dict(B=2, S=8, E=20, D=32),    # row-wise fallback ((S*E) % 128 != 0)
    ]
    ok = True
    for i, cfg in enumerate(cases):
        key, case_key = jax.random.split(key)
        enc, dec_h, ctx, params = _make_case(case_key, **cfg)
        out = jax.block_until_ready(
            scratchpad_forward(enc, dec_h, ctx, params))
        ref = _reference(enc, dec_h, ctx, params)
        assert out.shape == enc.shape
        if not jnp.allclose(out, ref, atol=2e-5, rtol=2e-5):
            ok = False
            print(f"case {i} mismatch: max abs err = "
                  f"{float(jnp.max(jnp.abs(out - ref))):.3e}")

    # TODO(synk): the original module's Log.plot_heatmaps / forwards-counter side
    # effect is host-only and not reproduced.
    if ok:
        print("KERNEL_OK")
</pallas_src>

<mosaic_0001>
module attributes {stable_mosaic.version = 11 : i64} {
  func.func @_fused_lane_dense_kernel(%arg0: i32, %arg1: i32, %arg2: memref<1x1x49xf32, #tpu.memory_space<vmem>>, %arg3: memref<1x49xf32, #tpu.memory_space<vmem>>, %arg4: memref<1x49x128xf32, #tpu.memory_space<vmem>>, %arg5: memref<1x1x128xf32, #tpu.memory_space<vmem>>, %arg6: memref<1x1x128xf32, #tpu.memory_space<vmem>>, %arg7: memref<1x1xf32, #tpu.memory_space<vmem>>, %arg8: memref<1x128xf32, #tpu.memory_space<vmem>>) attributes {dimension_semantics = [#tpu.dimension_semantics<parallel>, #tpu.dimension_semantics<arbitrary>], iteration_bounds = array<i64: 2, 1>, scalar_prefetch = 0 : i64, scratch_operands = 2 : i64, tpu.core_type = #tpu.core_type<tc>, window_params = [{transform_indices = @transform_0, window_bounds = array<i64: 1, 1, 49>}, {pipeline_mode = #tpu.pipeline_mode<synchronous>, transform_indices = @transform_1, window_bounds = array<i64: 1, 49>}, {pipeline_mode = #tpu.pipeline_mode<synchronous>, transform_indices = @transform_2, window_bounds = array<i64: 1, 49, 128>}, {transform_indices = @transform_3, window_bounds = array<i64: 1, 1, 128>}, {transform_indices = @transform_4, window_bounds = array<i64: 1, 1, 128>}]} {
    %c0_i32 = arith.constant 0 : i32
    %0 = arith.cmpi eq, %arg1, %c0_i32 : i32
    %1 = arith.extui %0 : i1 to i32
    %c0_i32_0 = arith.constant 0 : i32
    %2 = arith.cmpi ne, %1, %c0_i32_0 : i32
    scf.if %2 {
      %c0_10 = arith.constant 0 : index
      %c0_11 = arith.constant 0 : index
      %c0_12 = arith.constant 0 : index
      %12 = vector.load %arg2[%c0_10, %c0_11, %c0_12] : memref<1x1x49xf32, #tpu.memory_space<vmem>>, vector<1x1x49xf32>
      %13 = vector.shape_cast %12 : vector<1x1x49xf32> to vector<1x49xf32>
      %c0_13 = arith.constant 0 : index
      %c0_14 = arith.constant 0 : index
      %14 = vector.load %arg3[%c0_13, %c0_14] : memref<1x49xf32, #tpu.memory_space<vmem>>, vector<1x49xf32>
      %15 = arith.mulf %13, %14 : vector<1x49xf32>
      %cst = arith.constant dense<0.000000e+00> : vector<1xf32>
      %16 = vector.multi_reduction <add>, %15, %cst [1] : vector<1x49xf32> to vector<1xf32>
      %17 = vector.shape_cast %16 : vector<1xf32> to vector<1x1xf32>
      %18 = arith.negf %17 : vector<1x1xf32>
      %19 = math.exp %18 : vector<1x1xf32>
      %cst_15 = arith.constant 1.000000e+00 : f32
      %20 = vector.broadcast %cst_15 : f32 to vector<1x1xf32>
      %21 = arith.addf %20, %19 : vector<1x1xf32>
      %22 = arith.divf %20, %21 : vector<1x1xf32>
      %c0_16 = arith.constant 0 : index
      %c0_17 = arith.constant 0 : index
      %23 = vector.load %arg7[%c0_16, %c0_17] : memref<1x1xf32, #tpu.memory_space<vmem>>, vector<1x1xf32>
      tpu.vector_store %arg7[%c0_16, %c0_17], %22 {strides = array<i32>} : memref<1x1xf32, #tpu.memory_space<vmem>>, vector<1x1xf32>,
      %cst_18 = arith.constant 1.000000e+00 : f32
      %24 = vector.broadcast %cst_18 : f32 to vector<1x1xf32>
      %25 = arith.subf %24, %22 : vector<1x1xf32>
      %c0_19 = arith.constant 0 : index
      %c0_20 = arith.constant 0 : index
      %c0_21 = arith.constant 0 : index
      %26 = vector.load %arg4[%c0_19, %c0_20, %c0_21] : memref<1x49x128xf32, #tpu.memory_space<vmem>>, vector<1x49x128xf32>
      %27 = vector.shape_cast %26 : vector<1x49x128xf32> to vector<49x128xf32>
      %cst_22 = arith.constant dense<0.000000e+00> : vector<1x128xf32>
      %28 = tpu.matmul %13, %27, %cst_22 {dimension_numbers = #tpu.dot_dimension_numbers<[1], [0], [0], [1], [0, 0, 1, 1], [], []>} : vector<1x49xf32>, vector<49x128xf32>, vector<1x128xf32> -> vector<1x128xf32>
      %29 = math.tanh %28 : vector<1x128xf32>
      %30 = vector.broadcast %25 : vector<1x1xf32> to vector<1x128xf32>
      %31 = arith.mulf %30, %29 : vector<1x128xf32>
      %c0_23 = arith.constant 0 : index
      %c0_24 = arith.constant 0 : index
      %32 = vector.load %arg8[%c0_23, %c0_24] : memref<1x128xf32, #tpu.memory_space<vmem>>, vector<1x128xf32>
      tpu.vector_store %arg8[%c0_23, %c0_24], %31 {strides = array<i32>} : memref<1x128xf32, #tpu.memory_space<vmem>>, vector<1x128xf32>,
    } else {
    }
    %c0 = arith.constant 0 : index
    %c0_1 = arith.constant 0 : index
    %3 = vector.load %arg7[%c0, %c0_1] : memref<1x1xf32, #tpu.memory_space<vmem>>, vector<1x1xf32>
    %4 = vector.shape_cast %3 : vector<1x1xf32> to vector<1x1x1xf32>
    %c0_2 = arith.constant 0 : index
    %c0_3 = arith.constant 0 : index
    %c0_4 = arith.constant 0 : index
    %5 = vector.load %arg5[%c0_2, %c0_3, %c0_4] : memref<1x1x128xf32, #tpu.memory_space<vmem>>, vector<1x1x128xf32>
    %6 = vector.broadcast %4 : vector<1x1x1xf32> to vector<1x1x128xf32>
    %7 = arith.mulf %6, %5 : vector<1x1x128xf32>
    %c0_5 = arith.constant 0 : index
    %c0_6 = arith.constant 0 : index
    %8 = vector.load %arg8[%c0_5, %c0_6] : memref<1x128xf32, #tpu.memory_space<vmem>>, vector<1x128xf32>
    %9 = vector.shape_cast %8 : vector<1x128xf32> to vector<1x1x128xf32>
    %10 = arith.addf %7, %9 : vector<1x1x128xf32>
    %c0_7 = arith.constant 0 : index
    %c0_8 = arith.constant 0 : index
    %c0_9 = arith.constant 0 : index
    %11 = vector.load %arg6[%c0_7, %c0_8, %c0_9] : memref<1x1x128xf32, #tpu.memory_space<vmem>>, vector<1x1x128xf32>
    tpu.vector_store %arg6[%c0_7, %c0_8, %c0_9], %10 {strides = array<i32>} : memref<1x1x128xf32, #tpu.memory_space<vmem>>, vector<1x1x128xf32>,
    return
  }
  func.func @transform_0(%arg0: i32, %arg1: i32) -> (i32, i32, i32) {
    %c0_i32 = arith.constant 0 : i32
    %c0_i32_0 = arith.constant 0 : i32
    %c0_i32_1 = arith.constant 0 : i32
    return %arg0, %c0_i32, %c0_i32_0 : i32, i32, i32
  }
  func.func @transform_1(%arg0: i32, %arg1: i32) -> (i32, i32) {
    %c0_i32 = arith.constant 0 : i32
    %c0_i32_0 = arith.constant 0 : i32
    %c0_i32_1 = arith.constant 0 : i32
    return %c0_i32, %c0_i32_0 : i32, i32
  }
  func.func @transform_2(%arg0: i32, %arg1: i32) -> (i32, i32, i32) {
    %c0_i32 = arith.constant 0 : i32
    %c0_i32_0 = arith.constant 0 : i32
    %c0_i32_1 = arith.constant 0 : i32
    %c0_i32_2 = arith.constant 0 : i32
    return %c0_i32, %c0_i32_0, %c0_i32_1 : i32, i32, i32
  }
  func.func @transform_3(%arg0: i32, %arg1: i32) -> (i32, i32, i32) {
    %c0_i32 = arith.constant 0 : i32
    %c0_i32_0 = arith.constant 0 : i32
    return %arg0, %arg1, %c0_i32 : i32, i32, i32
  }
  func.func @transform_4(%arg0: i32, %arg1: i32) -> (i32, i32, i32) {
    %c0_i32 = arith.constant 0 : i32
    %c0_i32_0 = arith.constant 0 : i32
    return %arg0, %arg1, %c0_i32 : i32, i32, i32
  }
}

</mosaic_0001>

<bundles_post_ra>
// kernel: tpu_custom_call.1
= control target key start
LH: loop header
LB: loop body
LE: loop exit
PB: predicated region body
PF: predicated region fallthrough
CT: control target
= control target key end

     0   :  { %9 = vsyncpa [#allocation5], 0  ;;  %s705_s0 = inlined_call_operand.vmem [shape: f32[2,1,49], index: 0, kind: input, shape index: {}]   ;;  %s706_s1 = inlined_call_operand.vmem [shape: f32[1,49], index: 1, kind: input, shape index: {}]   ;;  %s707_s2 = inlined_call_operand.vmem [shape: f32[1,49,128], index: 2, kind: input, shape index: {}]   ;;  %s708_s3 = inlined_call_operand.vmem [shape: f32[2,1,128], index: 3, kind: input, shape index: {}]   ;;  %s709_s4 = inlined_call_operand.hbm [shape: f32[2,1,128], index: 4, kind: output, shape index: {}]  }
   0x1   :  { %11 = vsyncpa [#allocation5 + $0x1], 0  ;;  %s577_s15 = smov 0   ;;  %s579_s16 = smov 0  }
   0x2   :  { %s581_s17 = smov 0   ;;  %s583_s18 = smov 0  }
   0x3   :  { %s585_s19 = smov 0   ;;  %s587_s20 = smov 0  }
   0x4 LB: > { %s398_s21 = sadd.s32 4294967295, %s549_s20   ;;  %s399_s22 = sadd.s32 4294967294, %s549_s20   ;;  %s549_s20 = sphi %s587_s20, %s17_s20   ;;  %s545_s19 = sphi %s585_s19, %s716_s19   ;;  %s541_s18 = sphi %s583_s18, %s715_s18   ;;  %s537_s17 = sphi %s581_s17, %s714_s17   ;;  %s533_s16 = sphi %s579_s16, %s713_s16   ;;  %s529_s15 = sphi %s577_s15, %s712_s15  }
   0x5   : > { %s29_s23 = sadd.s32 1, %s545_s19  ;;  %s134_s24 = sadd.s32 1, %s537_s17 }
   0x6   : > { %p31_p0 = scmp.ge.s32.totalorder %s29_s23, 2  ;;  %p144_p1 = scmp.ne.s32.totalorder %s537_s17, %s533_s16 }
   0x7   : > { %p145_p2 = scmp.eq.s32.totalorder %s398_s21, 1  ;;  %p150_p3 = scmp.ne.s32.totalorder %s533_s16, %s529_s15 }
   0x8   : > { %s718_s23 = smov (%p31_p0, %s29_s23), 0  ;;  %p151_p5 = scmp.eq.s32.totalorder %s399_s22, 1 }
   0x9   : > { %p617_p4 = por %p145_p2, %p144_p1  ;;  %s129_s26 = ssub.s32 %s545_s19, %s718_s23 }
   0xa   : > { %p402_p6 = scmp.ge.s32.totalorder %s549_s20, 1  ;;  %p132_p7 = scmp.eq.s32.totalorder %s129_s26, 0 }
   0xb   : > { %p624_p8 = por %p151_p5, %p150_p3  ;;  %p190_p9 = scmp.lt.s32.totalorder %s549_s20, 3 }
   0xc   : > { %s630_s28 = scalar_select %p132_p7, %s537_s17, %s134_s24  }
   0xd   : > { %p191_p10 = pnand %p402_p6, %p190_p9 }
   0xe   : > { %p219_p11 = scmp.lt.s32.totalorder (!%p191_p10), %s541_s18, 1  ;;  %s217_s8 = sand.u32 (!%p191_p10), 1, %s533_s16  }
   0xf   : > { %194 = sbr.rel (%p191_p10) target bundleno = 303 (0x12f), region = 36  ;;  %s218_s21 = scalar_lea.vmem (!%p191_p10), [#allocation4], %s217_s8 }
  0x10   : > { %s323_s22 = sshll.u32 (!%p191_p10), %s218_s21, 4  ;;  %s312_s26 = scalar_lea.sflag (!%p191_p10), [#allocation5], %s217_s8  ;;  %s324_s22 = int_to_ptr.vmem [resolvable:$true] %s323_s22 }
  0x11   : > { %s491_s5 = scalar_lea.hbm (!%p191_p10), %s709_s4, 2 }
  0x14   : > { %v267_v0 = vld [vmem:[%s707_s2 + $0x30] sm:$0x1]  ;;  %vm272_vm0 = vcmask 1040384   ;;  %v266_v1 = vld [vmem:[%s707_s2 + $0x28] sm:$0xff]  ;;  %s640_s7 = scalar_select %p219_p11, %s541_s18, 1  ;;  %v265_v2 = vld [vmem:[%s707_s2 + $0x20] sm:$0xff] }
  0x15   : > { %404 = vmatpush.msk.msra.mxu0 %vm272_vm0, %v267_v0  ;;  %v233_v3 = vld [vmem:[%s706_s1] sm:$0x1]  ;;  %v264_v4 = vld [vmem:[%s707_s2 + $0x18] sm:$0xff]  ;;  %vm235_vm1 = vcmask 393216   ;;  %v263_v7 = vld [vmem:[%s707_s2 + $0x10] sm:$0xff]  ;;  %vm268_vm2 = vcmask 400384  }
  0x16   : > { %s221_s14 = scalar_lea.vmem %s705_s0, %s640_s7  ;;  %v262_v9 = vld [vmem:[%s707_s2 + $0x8] sm:$0xff]  ;;  %v261_v10 = vld [vmem:[%s707_s2] sm:$0xff]  ;;  %v551_v13 = vmov 0   ;;  %vm258_vm6 = vcmask 0   ;;  %s227_s11 = scalar_lea.vmem %s708_s3, %s640_s7 }
  0x17   : > { %286 = vmatpush.msra.mxu0 %v266_v1  ;;  %v232_v5 = vld [vmem:[%s221_s14] sm:$0x1]  ;;  %464 = vset.pattern.permute.xlu0 %v551_v13  ;;  %s321_s14 = scalar_lea.hbm %s709_s4, %s541_s18 }
  0x18   : > { %v234_v6 = vmul.f32 %v233_v3, %v232_v5  ;;  %v300_v31 = vld [vmem:[%s227_s11] sm:$0x1]  ;;  %s325_s24 = sshll.u32 %s321_s14, 4  ;;  %s326_s24 = int_to_ptr.hbm [resolvable:$true] %s325_s24 }
  0x19   : > { %287 = vmatpush.msra.mxu0 %v265_v2  ;;  %s485_s29 = sshra.s32 %s326_s24, 4  ;;  %s486_s29 = int_to_ptr.hbm [resolvable:$true] %s485_s29 }
  0x1a   : > { %v236_v8 = vsel %vm235_vm1, %v234_v6, 0.0  ;;  %s487_s7 = scalar_lea.hbm %s486_s29, 1  ;;  %p492_p1 = scmp.lt.s32.totalorder %s486_s29, %s709_s4 }
  0x1b   : > { %288 = vmatpush.msra.mxu0 %v264_v4  ;;  %237 = vadd.xlane.f32.xlu0 %v236_v8  ;;  %p488_p12 = scmp.ne.s32.totalorder %s486_s29, %s487_s7  ;;  %p493_p2 = scmp.lt.s32.totalorder %s491_s5, %s487_s7 }
  0x1d   : > { %289 = vmatpush.msra.mxu0 %v263_v7  ;;  %p489_p13 = pnand %p488_p12, %p617_p4  ;;  %p494_p3 = por %p493_p2, %p492_p1 }
  0x1f   : > { %290 = vmatpush.msra.mxu0 %v262_v9  ;;  %p490_p0 = pneg %p489_p13 }
  0x21   : > { %291 = vmatpush.msra.mxu0 %v261_v10  ;;  %p495_p5 = pnand %p494_p3, %p490_p0 }
  0x22   : > { %405 = vmatmul.msk.f32.vlgmr.msra.gmra.mxu0 %vm268_vm2, %v232_v5 }
  0x8e   : > { %v238_v11 = vpop.xlane.xlu0 %237 }
  0x8f   : > { %v403_v12 = vmul.f32 -1.442695, %v238_v11 }
  0x91   : > { %465 = vpow2.f32 %v403_v12 }
  0x97   : > { %v466_v14 = vpop.eup %465 }
  0x98   : > { %v242_v15 = vadd.f32 1.0, %v466_v14 }
  0x9a   : > { %467 = vrcp.f32 %v242_v15  ;;  %v254_v20 = vand.u32 2147483648, %v242_v15  ;;  %v252_v22 = vand.u32 2147483647, %v242_v15  ;;  %vm248_vm4 = vweird.f32 %v242_v15 }
  0x9c   : > { %v255_v24 = vor.u32 1.1754944e-38, %v254_v20  ;;  %vm253_vm7 = vcmp.eq.f32.partialorder %v252_v22, 8.507059e+37 }
  0x9f   : > { %v293_v18 = vpop.f32.mrf.mxu0 }
  0xa0   : > { %v468_v16 = vpop.eup %467  ;;  %469 = vtanh.f32 %v293_v18 }
  0xa1   : > { %v244_v17 = vmul.f32 %v468_v16, %v242_v15  ;;  %vm249_vm3 = vweird.f32 %v468_v16 }
  0xa2   : > { %vm250_vm5 = vmor %vm248_vm4, %vm249_vm3 }
  0xa3   : > { %v245_v19 = vsub.f32 1.0, %v244_v17 }
  0xa5   : > { %v246_v21 = vmul.f32 %v468_v16, %v245_v19 }
  0xa6   : > { %v470_v26 = vpop.eup %469 }
  0xa7   : > { %v247_v23 = vadd.f32 %v468_v16, %v246_v21 }
  0xa9   : > { %v251_v25 = vsel %vm250_vm5, %v468_v16, %v247_v23 }
  0xaa   : > { %v256_v27 = vsel %vm253_vm7, %v255_v24, %v251_v25 }
  0xab   : > { %259 = vst.msk [vmem:[#allocation2] sm:$0x1] %vm258_vm6, %v256_v27  ;;  %v260_v28 = vsub.f32 1.0, %v256_v27 }
  0xad   : > { %v297_v29 = vmul.f32 %v470_v26, %v260_v28 }
  0xaf   : > { %298 = vst [vmem:[#allocation3] sm:$0x1] %v297_v29 }
  0xb2   : > { %v299_v30 = vld [vmem:[#allocation2] sm:$0x1] }
  0xb3   : > { %303 = vperm.xlu0 %464, %v299_v30  }
  0xb6   : > { %v308_v35 = vld [vmem:[#allocation3] sm:$0x1] }
 0x125   : > { %v304_v32 = vpop.permute.xlu0 %303 }
 0x126   : > { %v306_v33 = vperm.slane %v304_v32, 0 }
 0x128   : > { %v307_v34 = vmul.f32 %v306_v33, %v300_v31 }
 0x12a   : > { %v309_v36 = vadd.f32 %v308_v35, %v307_v34 }
 0x12c   : > { %310 = vst [vmem:[%s218_s21] sm:$0x1] %v309_v36 }
 0x12d   : > { %498 = shalt.err (!%p495_p5)
}
 0x12e   : > { %408 = dma.vmem_to_hbm [thread:$0]  (%p617_p4), %s324_s22, 16, %s326_s24, %s312_s26  }
 0x12f PF: > { %p414_p6 = scmp.ge.s32.totalorder %s549_s20, 2  ;;  %s337_s8 = sand.u32 1, %s529_s15  }
 0x130   : > { %s338_s10 = scalar_lea.sflag [#allocation5], %s337_s8 }
 0x131   : > { %p411_p7 = pnand %p414_p6, %p624_p8 }
 0x133   : > { %p412_p9 = pneg %p411_p7 }
 0x135   : > { %524 = dma.done.wait (%p412_p9), %s338_s10, 16  }
 0x136   : > { %526 = vsyncadd (%p412_p9), %s338_s10, 4294967280  ;;  %s17_s20 = sadd.s32 1, %s549_s20   ;;  %s712_s15 = smov %s533_s16 }
 0x137   : > { %p14_p10 = scmp.ge.s32.totalorder %s17_s20, 4   ;;  %s713_s16 = smov %s537_s17 }
 0x138   : > { %s714_s17 = smov %s630_s28  ;;  %s715_s18 = smov %s545_s19 }
 0x139   : > { %s716_s19 = smov %s718_s23  ;;  %16 = sbr.rel (!%p14_p10) target bundleno = 4 (0x4), region = 78 }
 0x13e   :  { %343 = vsyncpa [#allocation5], 1 }
 0x13f   :  { %345 = vsyncpa [#allocation5 + $0x1], 1 }

</bundles_post_ra>
